<compile_context>
chip_gen: v5e
topology: v5e:2x2
jax: 0.10.0
libtpu: 0.0.40
codegen_flags: <defaults>
</compile_context>

<pallas_src>
import functools

import jax
import jax.numpy as jnp
from jax import lax
from jax.experimental import pallas as pl
from jax.experimental.pallas import tpu as pltpu

LN_EPS = 1e-5  # PyTorch nn.LayerNorm default


def _merge_kernel(x_ref, w_ref, p_ref, o_ref):
    # x_ref: (1, total, tm)  -- K on sublanes, row tile on lanes (lane-dense)
    # w_ref: (half, total)   -- PyTorch Linear layout as-is, K on lanes
    # p_ref: (half, 3) = [bias | gamma | beta]
    # o_ref: (1, half, tm)   -- transposed output slab, lane-dense stores
    x = x_ref[0]                       # (total, tm), native dtype
    w = w_ref[...]                     # (half, total), native dtype
    # z^T = W @ x : (half, tm); canonical MXU orientation, f32 accumulation.
    z = jnp.dot(w, x, preferred_element_type=jnp.float32)
    p = p_ref[...].astype(jnp.float32)
    bias, gamma, beta = p[:, 0:1], p[:, 1:2], p[:, 2:3]      # (half, 1) each
    z = z + bias
    # LayerNorm over the feature (sublane) axis; two-pass variance.
    mean = jnp.mean(z, axis=0, keepdims=True)                # (1, tm)
    zc = z - mean
    var = jnp.mean(zc * zc, axis=0, keepdims=True)           # (1, tm)
    inv = lax.rsqrt(var + LN_EPS)
    o_ref[0] = (zc * inv * gamma + beta).astype(o_ref.dtype)


def _vmem_need(tm, total, half, in_bytes, out_bytes):
    # double-buffered x and out blocks + resident weight (counted 2x) + slack
    return (2 * total * tm * in_bytes
            + 2 * half * tm * out_bytes
            + 2 * half * total * in_bytes
            + (1 << 20))


def _pick_row_tile(S, total, half, in_bytes, out_bytes, batch):
    """Largest lane-dense row tile (multiple of 128) that fits a safe VMEM budget."""
    if S < 128:
        return S  # tiny spatial: full-extent block (masked stores; toy-only path)
    target = 2048 if total <= 512 else 1024
    tm = max(128, min(target, (S // 128) * 128))
    budget = 40 << 20  # safely under v7x's 64 MiB physical VMEM on all generations
    while tm > 128 and _vmem_need(tm, total, half, in_bytes, out_bytes) > budget:
        tm -= 128
    # v7x megacore: make sure the parallel grid has at least two steps.
    while tm > 128 and batch * pl.cdiv(S, tm) < 2:
        tm = max(128, ((tm // 2) // 128) * 128)
    return tm


def _merge_proj_norm(x3, w, packed, out_dtype):
    """x3: (b, total, S) -> (b, half, S) fused Linear + LayerNorm (transposed write)."""
    b, total, S = x3.shape
    half = w.shape[0]
    in_bytes = x3.dtype.itemsize
    out_bytes = jnp.dtype(out_dtype).itemsize

    tm = _pick_row_tile(S, total, half, in_bytes, out_bytes, b)
    grid = (b, pl.cdiv(S, tm))
    vmem_limit = min(_vmem_need(tm, total, half, in_bytes, out_bytes) + (8 << 20),
                     48 << 20)

    cost = pl.CostEstimate(
        flops=2 * b * S * total * half + 8 * b * S * half,
        transcendentals=b * S,
        bytes_accessed=(x3.size * in_bytes
                        + w.size * w.dtype.itemsize
                        + packed.size * packed.dtype.itemsize
                        + b * half * S * out_bytes),
    )

    return pl.pallas_call(
        _merge_kernel,
        out_shape=jax.ShapeDtypeStruct((b, half, S), out_dtype),
        grid_spec=pltpu.PrefetchScalarGridSpec(
            num_scalar_prefetch=0,
            grid=grid,
            in_specs=[
                pl.BlockSpec((1, total, tm), lambda bi, si: (bi, 0, si)),
                pl.BlockSpec((half, total), lambda bi, si: (0, 0)),
                pl.BlockSpec((half, 3), lambda bi, si: (0, 0)),
            ],
            out_specs=pl.BlockSpec((1, half, tm), lambda bi, si: (bi, 0, si)),
        ),
        compiler_params=pltpu.CompilerParams(
            dimension_semantics=("parallel", "parallel"),
            # Let XLA fuse the patch-extraction rearrange into the x operand read
            # instead of materializing it in HBM (kernel is HBM-bound).
            allow_input_fusion=[True, False, False],
            vmem_limit_bytes=int(vmem_limit),
        ),
        cost_estimate=cost,
    )(x3, w, packed)


def merge3d_forward(x, params, kernel_size, *, compute_dtype=None):
    """Forward of Merge3d.

    x: (b, c, D, H, W) (NCDHW, same as PyTorch); returns (b, half, d, h, w).
    compute_dtype: optionally cast the big x / W streams (e.g. jnp.bfloat16) inside
      the rearrange pass; MXU accumulation stays f32, output keeps x.dtype.
    """
    dk, hk, wk = kernel_size
    b, c, D, H, W = x.shape
    d, h, w = D // dk, H // hk, W // wk
    total = c * dk * hk * wk
    half = total // 2
    S = d * h * w

    # 'b c (d dk)(h hk)(w wk) -> b (dk hk wk c) (d h w)'  -- transposed feed:
    # features on sublanes, spatial rows on lanes; the feature order matches the
    # PyTorch Linear weight layout so proj_w is used as-is (no wrapper .T).
    x8 = x.reshape(b, c, d, dk, h, hk, w, wk)
    x3 = jnp.transpose(x8, (0, 3, 5, 7, 1, 2, 4, 6)).reshape(b, total, S)

    proj_w = params["proj_w"]
    if compute_dtype is not None:
        x3 = x3.astype(compute_dtype)
        proj_w = proj_w.astype(compute_dtype)

    packed = jnp.stack(
        [params["proj_b"], params["ln_g"], params["ln_b"]], axis=-1
    ).astype(jnp.float32)                                    # (half, 3)

    y = _merge_proj_norm(x3, proj_w, packed, x.dtype)        # (b, half, S)
    # 'b c (d h w) -> b c d h w' is a pure reshape (no transpose, no extra HBM pass).
    return y.reshape(b, half, d, h, w)


def _reference_forward(x, params, kernel_size):
    """Pure-JAX reference for correctness check."""
    dk, hk, wk = kernel_size
    b, c, D, H, W = x.shape
    d, h, w = D // dk, H // hk, W // wk
    total = c * dk * hk * wk
    xr = x.reshape(b, c, d, dk, h, hk, w, wk)
    xr = jnp.transpose(xr, (0, 2, 4, 6, 3, 5, 7, 1)).reshape(b, d, h, w, total)
    z = xr.astype(jnp.float32) @ params["proj_w"].T.astype(jnp.float32) + params["proj_b"]
    mean = jnp.mean(z, axis=-1, keepdims=True)
    var = jnp.mean((z - mean) ** 2, axis=-1, keepdims=True)
    zn = (z - mean) / jnp.sqrt(var + LN_EPS)
    y = zn * params["ln_g"] + params["ln_b"]
    return jnp.transpose(y, (0, 4, 1, 2, 3)).astype(x.dtype)


if __name__ == "__main__":
    key = jax.random.PRNGKey(0)

    # Small shapes: batch=2, in_channels=4, spatial D=H=W=16, kernel_size=2
    b, c = 2, 4
    D = H = W = 16
    kernel_size = (2, 2, 2)
    total = c * kernel_size[0] * kernel_size[1] * kernel_size[2]  # 32
    half = total // 2                                             # 16

    kx, kw, kb = jax.random.split(key, 3)
    x = jax.random.normal(kx, (b, c, D, H, W), dtype=jnp.float32)

    # Deterministic parameter init (nn.Linear(total, half) + nn.LayerNorm(half))
    bound = 1.0 / (total ** 0.5)
    params = {
        "proj_w": jax.random.uniform(kw, (half, total), jnp.float32, -bound, bound),
        "proj_b": jax.random.uniform(kb, (half,), jnp.float32, -bound, bound),
        "ln_g": jnp.ones((half,), jnp.float32),
        "ln_b": jnp.zeros((half,), jnp.float32),
    }

    fwd = jax.jit(functools.partial(merge3d_forward, kernel_size=kernel_size))
    out = fwd(x, params)
    out = jax.block_until_ready(out)

    ref = _reference_forward(x, params, kernel_size)
    assert out.shape == (b, half, D // 2, H // 2, W // 2), out.shape
    assert jnp.allclose(out, ref, atol=5e-4, rtol=5e-4), "mismatch vs reference"

    print("KERNEL_OK")
</pallas_src>

<mosaic_0001>
module attributes {stable_mosaic.version = 11 : i64} {
  func.func @_merge_kernel(%arg0: i32, %arg1: i32, %arg2: memref<1x32x512xf32, #tpu.memory_space<vmem>>, %arg3: memref<16x32xf32, #tpu.memory_space<vmem>>, %arg4: memref<16x3xf32, #tpu.memory_space<vmem>>, %arg5: memref<1x16x512xf32, #tpu.memory_space<vmem>>) attributes {dimension_semantics = [#tpu.dimension_semantics<parallel>, #tpu.dimension_semantics<parallel>], iteration_bounds = array<i64: 2, 1>, scalar_prefetch = 0 : i64, scratch_operands = 0 : i64, tpu.core_type = #tpu.core_type<tc>, window_params = [{transform_indices = @transform_0, window_bounds = array<i64: 1, 32, 512>}, {pipeline_mode = #tpu.pipeline_mode<synchronous>, transform_indices = @transform_1, window_bounds = array<i64: 16, 32>}, {pipeline_mode = #tpu.pipeline_mode<synchronous>, transform_indices = @transform_2, window_bounds = array<i64: 16, 3>}, {transform_indices = @transform_3, window_bounds = array<i64: 1, 16, 512>}]} {
    %c0 = arith.constant 0 : index
    %c0_0 = arith.constant 0 : index
    %c0_1 = arith.constant 0 : index
    %0 = vector.load %arg2[%c0, %c0_0, %c0_1] : memref<1x32x512xf32, #tpu.memory_space<vmem>>, vector<1x32x512xf32>
    %1 = vector.shape_cast %0 : vector<1x32x512xf32> to vector<32x512xf32>
    %c0_2 = arith.constant 0 : index
    %c0_3 = arith.constant 0 : index
    %2 = vector.load %arg3[%c0_2, %c0_3] : memref<16x32xf32, #tpu.memory_space<vmem>>, vector<16x32xf32>
    %cst = arith.constant dense<0.000000e+00> : vector<16x512xf32>
    %3 = tpu.matmul %2, %1, %cst {dimension_numbers = #tpu.dot_dimension_numbers<[1], [0], [0], [1], [0, 0, 1, 1], [], []>} : vector<16x32xf32>, vector<32x512xf32>, vector<16x512xf32> -> vector<16x512xf32>
    %c0_4 = arith.constant 0 : index
    %c0_5 = arith.constant 0 : index
    %4 = vector.load %arg4[%c0_4, %c0_5] : memref<16x3xf32, #tpu.memory_space<vmem>>, vector<16x3xf32>
    %5 = vector.extract_strided_slice %4 {offsets = [0, 0], sizes = [16, 1], strides = [1, 1]} : vector<16x3xf32> to vector<16x1xf32>
    %6 = vector.extract_strided_slice %4 {offsets = [0, 1], sizes = [16, 1], strides = [1, 1]} : vector<16x3xf32> to vector<16x1xf32>
    %7 = vector.extract_strided_slice %4 {offsets = [0, 2], sizes = [16, 1], strides = [1, 1]} : vector<16x3xf32> to vector<16x1xf32>
    %8 = vector.broadcast %5 : vector<16x1xf32> to vector<16x512xf32>
    %9 = arith.addf %3, %8 : vector<16x512xf32>
    %cst_6 = arith.constant dense<0.000000e+00> : vector<512xf32>
    %10 = vector.multi_reduction <add>, %9, %cst_6 [0] : vector<16x512xf32> to vector<512xf32>
    %11 = vector.shape_cast %10 : vector<512xf32> to vector<1x512xf32>
    %cst_7 = arith.constant 1.600000e+01 : f32
    %12 = vector.broadcast %cst_7 : f32 to vector<1x512xf32>
    %13 = arith.divf %11, %12 : vector<1x512xf32>
    %14 = vector.broadcast %13 : vector<1x512xf32> to vector<16x512xf32>
    %15 = arith.subf %9, %14 : vector<16x512xf32>
    %16 = arith.mulf %15, %15 : vector<16x512xf32>
    %cst_8 = arith.constant dense<0.000000e+00> : vector<512xf32>
    %17 = vector.multi_reduction <add>, %16, %cst_8 [0] : vector<16x512xf32> to vector<512xf32>
    %18 = vector.shape_cast %17 : vector<512xf32> to vector<1x512xf32>
    %cst_9 = arith.constant 1.600000e+01 : f32
    %19 = vector.broadcast %cst_9 : f32 to vector<1x512xf32>
    %20 = arith.divf %18, %19 : vector<1x512xf32>
    %cst_10 = arith.constant 9.99999974E-6 : f32
    %21 = vector.broadcast %cst_10 : f32 to vector<1x512xf32>
    %22 = arith.addf %20, %21 : vector<1x512xf32>
    %23 = math.rsqrt %22 : vector<1x512xf32>
    %24 = vector.broadcast %23 : vector<1x512xf32> to vector<16x512xf32>
    %25 = arith.mulf %15, %24 : vector<16x512xf32>
    %26 = vector.broadcast %6 : vector<16x1xf32> to vector<16x512xf32>
    %27 = arith.mulf %25, %26 : vector<16x512xf32>
    %28 = vector.broadcast %7 : vector<16x1xf32> to vector<16x512xf32>
    %29 = arith.addf %27, %28 : vector<16x512xf32>
    %c0_11 = arith.constant 0 : index
    %c0_12 = arith.constant 0 : index
    %c0_13 = arith.constant 0 : index
    %30 = vector.load %arg5[%c0_11, %c0_12, %c0_13] : memref<1x16x512xf32, #tpu.memory_space<vmem>>, vector<1x16x512xf32>
    %31 = vector.shape_cast %30 : vector<1x16x512xf32> to vector<16x512xf32>
    %32 = vector.shape_cast %29 : vector<16x512xf32> to vector<1x16x512xf32>
    tpu.vector_store %arg5[%c0_11, %c0_12, %c0_13], %32 {strides = array<i32>} : memref<1x16x512xf32, #tpu.memory_space<vmem>>, vector<1x16x512xf32>,
    return
  }
  func.func @transform_0(%arg0: i32, %arg1: i32) -> (i32, i32, i32) {
    %c0_i32 = arith.constant 0 : i32
    %c0_i32_0 = arith.constant 0 : i32
    return %arg0, %c0_i32, %arg1 : i32, i32, i32
  }
  func.func @transform_1(%arg0: i32, %arg1: i32) -> (i32, i32) {
    %c0_i32 = arith.constant 0 : i32
    %c0_i32_0 = arith.constant 0 : i32
    %c0_i32_1 = arith.constant 0 : i32
    return %c0_i32, %c0_i32_0 : i32, i32
  }
  func.func @transform_2(%arg0: i32, %arg1: i32) -> (i32, i32) {
    %c0_i32 = arith.constant 0 : i32
    %c0_i32_0 = arith.constant 0 : i32
    %c0_i32_1 = arith.constant 0 : i32
    return %c0_i32, %c0_i32_0 : i32, i32
  }
  func.func @transform_3(%arg0: i32, %arg1: i32) -> (i32, i32, i32) {
    %c0_i32 = arith.constant 0 : i32
    %c0_i32_0 = arith.constant 0 : i32
    return %arg0, %c0_i32, %arg1 : i32, i32, i32
  }
}

</mosaic_0001>

<bundles_post_ra>
// kernel: merge3d_forward.1
= control target key start
LH: loop header
LB: loop body
LE: loop exit
PB: predicated region body
PF: predicated region fallthrough
CT: control target
= control target key end

     0   :  { %s716_s12 = smov 0   ;;  %s718_s13 = smov 0   ;;  %s846_s0 = inlined_call_operand.vmem [shape: f32[2,32,512], index: 0, kind: input, shape index: {}]   ;;  %s847_s1 = inlined_call_operand.vmem [shape: f32[16,32], index: 1, kind: input, shape index: {}]   ;;  %s848_s2 = inlined_call_operand.vmem [shape: f32[16,3], index: 2, kind: input, shape index: {}]   ;;  %s849_s3 = inlined_call_operand.vmem [shape: f32[2,16,512], index: 3, kind: output, shape index: {}]  }
   0x1   :  { %s720_s14 = smov 0  }
   0x2 LB: > { %s25_s15 = sadd.s32 1, %s686_s13  ;;  %p609_p0 = scmp.ge.s32.totalorder %s690_s14, 1  ;;  %s690_s14 = sphi %s720_s14, %s13_s14   ;;  %s686_s13 = sphi %s718_s13, %s851_s13   ;;  %s682_s12 = sphi %s716_s12, %s850_s12  }
   0x3   : > { %p27_p1 = scmp.ge.s32.totalorder %s25_s15, 2  ;;  %p158_p2 = scmp.lt.s32.totalorder %s690_s14, 3 }
   0x5   : > { %s853_s15 = smov (%p27_p1, %s25_s15), 0  ;;  %p159_p3 = pnand %p609_p0, %p158_p2 }
   0x6   : > { %p191_p4 = scmp.lt.s32.totalorder (!%p159_p3), %s682_s12, 1 }
   0x7   : > { %162 = sbr.rel (%p159_p3) target bundleno = 233 (0xe9), region = 32 }
   0xc   : > { %v228_v0 = vld [vmem:[%s848_s2] sm:$0xff]  ;;  %v692_v1 = vmov 0   ;;  %s855_s12 = smov (!%p191_p4, %s682_s12), 1  ;;  %v693_v2 = vmov 1   ;;  %v694_v3 = vmov 2   ;;  %vm240_vm0 = vcmask 261120  }
   0xd   : > { %654 = vset.pattern.permute.xlu0 %v692_v1  ;;  %655 = vset.pattern.permute.xlu1 %v693_v2  ;;  %s624_s18 = sshll.u32 %s855_s12, 7  ;;  %v226_v20 = vld [vmem:[%s847_s1] sm:$0xff]  ;;  %v229_v21 = vld [vmem:[%s848_s2 + $0x8] sm:$0xff]  ;;  %v695_v24 = vmov 16.0   ;;  %s625_s28 = sshll.u32 %s855_s12, 6 }
   0xe   : > { %232 = vperm.xlu0 %654, %v228_v0   ;;  %479 = vperm.xlu1 %655, %v228_v0   ;;  %s198_s21 = scalar_lea.vmem %s846_s0, %s624_s18  ;;  %v227_v22 = vld [vmem:[%s847_s1 + $0x8] sm:$0xff]  ;;  %658 = vrcp.f32 %v695_v24  ;;  %s816_s4 = scalar_lea.vmem %s849_s3, %s625_s28 }
   0xf   : > { %656 = vset.pattern.permute.xlu2 %v694_v3  ;;  %v222_v4 = vld [vmem:[%s198_s21 + $0x60] sm:$0xff]  ;;  %v223_v5 = vld [vmem:[%s198_s21 + $0x68] sm:$0xff]  ;;  %v224_v6 = vld [vmem:[%s198_s21 + $0x70] sm:$0xff] }
  0x10   : > { %495 = vperm.xlu2 %656, %v228_v0   ;;  %259 = vmatpush.msra.mxu0 %v222_v4  ;;  %v225_v7 = vld [vmem:[%s198_s21 + $0x78] sm:$0xff]  ;;  %v218_v8 = vld [vmem:[%s198_s21 + $0x40] sm:$0xff]  ;;  %v219_v9 = vld [vmem:[%s198_s21 + $0x48] sm:$0xff] }
  0x11   : > { %282 = vmatpush.msra.mxu1 %v223_v5  ;;  %305 = vmatpush.msra.mxu2 %v224_v6  ;;  %v220_v10 = vld [vmem:[%s198_s21 + $0x50] sm:$0xff]  ;;  %v221_v11 = vld [vmem:[%s198_s21 + $0x58] sm:$0xff]  ;;  %v214_v12 = vld [vmem:[%s198_s21 + $0x20] sm:$0xff] }
  0x12   : > { %328 = vmatpush.msra.mxu3 %v225_v7  ;;  %260 = vmatpush.msra.mxu0 %v218_v8  ;;  %v215_v13 = vld [vmem:[%s198_s21 + $0x28] sm:$0xff]  ;;  %v216_v14 = vld [vmem:[%s198_s21 + $0x30] sm:$0xff]  ;;  %v217_v15 = vld [vmem:[%s198_s21 + $0x38] sm:$0xff] }
  0x13   : > { %283 = vmatpush.msra.mxu1 %v219_v9  ;;  %306 = vmatpush.msra.mxu2 %v220_v10  ;;  %v210_v16 = vld [vmem:[%s198_s21] sm:$0xff]  ;;  %v211_v17 = vld [vmem:[%s198_s21 + $0x8] sm:$0xff]  ;;  %v212_v18 = vld [vmem:[%s198_s21 + $0x10] sm:$0xff] }
  0x14   : > { %329 = vmatpush.msra.mxu3 %v221_v11  ;;  %261 = vmatpush.msra.mxu0 %v214_v12  ;;  %v213_v19 = vld [vmem:[%s198_s21 + $0x18] sm:$0xff]  ;;  %v659_v27 = vpop.eup %658 }
  0x15   : > { %284 = vmatpush.msra.mxu1 %v215_v13  ;;  %307 = vmatpush.msra.mxu2 %v216_v14  ;;  %v368_v29 = vmul.f32 16.0, %v659_v27  ;;  %vm372_vm1 = vweird.f32 %v659_v27 }
  0x16   : > { %330 = vmatpush.msra.mxu3 %v217_v15  ;;  %262 = vmatpush.msra.mxu0 %v210_v16 }
  0x17   : > { %285 = vmatpush.msra.mxu1 %v211_v17  ;;  %308 = vmatpush.msra.mxu2 %v212_v18  ;;  %v369_v38 = vsub.f32 1.0, %v368_v29 }
  0x18   : > { %331 = vmatpush.msra.mxu3 %v213_v19  ;;  %614 = vmatmul.msk.f32.vlgmr.msra.gmra.mxu0 %vm240_vm0, %v226_v20 }
  0x19   : > { %616 = vmatmul.msk.f32.vlgmr.msra.gmra.mxu1 %vm240_vm0, %v226_v20  ;;  %618 = vmatmul.msk.f32.vlgmr.msra.gmra.mxu2 %vm240_vm0, %v226_v20  ;;  %v370_v43 = vmul.f32 %v659_v27, %v369_v38 }
  0x1a   : > { %620 = vmatmul.msk.f32.vlgmr.msra.gmra.mxu3 %vm240_vm0, %v226_v20  ;;  %237 = vperm.xlu0 %654, %v229_v21  }
  0x1b   : > { %483 = vperm.xlu1 %655, %v229_v21   ;;  %499 = vperm.xlu2 %656, %v229_v21   ;;  %v371_v54 = vadd.f32 %v659_v27, %v370_v43 }
  0x1d   : > { %v760_v63 = vsel %vm372_vm1, %v659_v27, %v371_v54 }
  0x20   : > { %615 = vmatmul.msk.f32.gmra.mxu0 %vm240_vm0, %v227_v22 }
  0x21   : > { %617 = vmatmul.msk.f32.gmra.mxu1 %vm240_vm0, %v227_v22  ;;  %619 = vmatmul.msk.f32.gmra.mxu2 %vm240_vm0, %v227_v22 }
  0x22   : > { %621 = vmatmul.msk.f32.gmra.mxu3 %vm240_vm0, %v227_v22  ;;  %657 = vset.pattern.permute.xlu0 %v694_v3 }
  0x80   : > { %v233_v23 = vpop.permute.xlu0 %232 }
  0x8c   : > { %v238_v28 = vpop.permute.xlu0 %237 }
  0x95   : > { %v264_v25 = vpop.f32.mrf.mxu0 }
  0x96   : > { %v287_v26 = vpop.f32.mrf.mxu1  ;;  %v265_v34 = vadd.f32 %v264_v25, %v233_v23 }
  0x97   : > { %v288_v35 = vadd.f32 %v287_v26, %v233_v23 }
  0x9c   : > { %v310_v30 = vpop.f32.mrf.mxu2 }
  0x9d   : > { %v333_v31 = vpop.f32.mrf.mxu3  ;;  %v267_v32 = vpop.f32.mrf.mxu0  ;;  %v311_v48 = vadd.f32 %v310_v30, %v233_v23 }
  0x9e   : > { %v290_v33 = vpop.f32.mrf.mxu1  ;;  %v268_v36 = vadd.f32 %v267_v32, %v238_v28  ;;  %v334_v49 = vadd.f32 %v333_v31, %v233_v23 }
  0x9f   : > { %v291_v37 = vadd.f32 %v290_v33, %v238_v28 }
  0xa0   : > { %v339_v39 = vadd.f32 %v268_v36, %v265_v34 }
  0xa1   : > { %v346_v40 = vadd.f32 %v291_v37, %v288_v35 }
  0xa2   : > { %v340_v41 = vrot.slane %v339_v39, 4 }
  0xa3   : > { %v347_v42 = vrot.slane %v346_v40, 4 }
  0xa4   : > { %v341_v44 = vadd.f32 %v340_v41, %v339_v39  ;;  %v313_v46 = vpop.f32.mrf.mxu2 }
  0xa5   : > { %v348_v45 = vadd.f32 %v347_v42, %v346_v40  ;;  %v336_v47 = vpop.f32.mrf.mxu3  ;;  %v314_v50 = vadd.f32 %v313_v46, %v238_v28 }
  0xa6   : > { %v337_v51 = vadd.f32 %v336_v47, %v238_v28  ;;  %v342_v52 = vrot.slane %v341_v44, 2 }
  0xa7   : > { %v349_v53 = vrot.slane %v348_v45, 2  ;;  %v353_v55 = vadd.f32 %v314_v50, %v311_v48 }
  0xa8   : > { %v360_v56 = vadd.f32 %v337_v51, %v334_v49  ;;  %v343_v57 = vadd.f32 %v342_v52, %v341_v44 }
  0xa9   : > { %v350_v58 = vadd.f32 %v349_v53, %v348_v45  ;;  %v354_v59 = vrot.slane %v353_v55, 4 }
  0xaa   : > { %v361_v60 = vrot.slane %v360_v56, 4  ;;  %v344_v61 = vrot.slane %v343_v57, 1 }
  0xab   : > { %v351_v62 = vrot.slane %v350_v58, 1  ;;  %v355_v0 = vadd.f32 %v354_v59, %v353_v55 }
  0xac   : > { %v362_v1 = vadd.f32 %v361_v60, %v360_v56  ;;  %v345_v2 = vadd.f32 %v344_v61, %v343_v57 }
  0xad   : > { %v352_v3 = vadd.f32 %v351_v62, %v350_v58  ;;  %v356_v4 = vrot.slane %v355_v0, 2 }
  0xae   : > { %v363_v5 = vrot.slane %v362_v1, 2  ;;  %v374_v6 = vmul.f32 %v760_v63, %v345_v2 }
  0xaf   : > { %v375_v7 = vmul.f32 %v760_v63, %v352_v3  ;;  %v357_v8 = vadd.f32 %v356_v4, %v355_v0 }
  0xb0   : > { %v364_v9 = vadd.f32 %v363_v5, %v362_v1  ;;  %v764_v10 = vsub.f32 %v265_v34, %v374_v6  ;;  %v766_v11 = vsub.f32 %v268_v36, %v374_v6 }
  0xb1   : > { %v768_v12 = vsub.f32 %v288_v35, %v375_v7  ;;  %v770_v13 = vsub.f32 %v291_v37, %v375_v7  ;;  %v358_v14 = vrot.slane %v357_v8, 1 }
  0xb2   : > { %v365_v15 = vrot.slane %v364_v9, 1  ;;  %v386_v16 = vmul.f32 %v764_v10, %v764_v10  ;;  %v390_v17 = vmul.f32 %v766_v11, %v766_v11 }
  0xb3   : > { %v387_v18 = vmul.f32 %v768_v12, %v768_v12  ;;  %v391_v19 = vmul.f32 %v770_v13, %v770_v13  ;;  %v359_v20 = vadd.f32 %v358_v14, %v357_v8  ;;  %v802_v14 = vpop.permute.xlu1 %479 }
  0xb4   : > { %v366_v21 = vadd.f32 %v365_v15, %v364_v9  ;;  %v394_v22 = vadd.f32 %v390_v17, %v386_v16  ;;  %v804_v17 = vpop.permute.xlu2 %495 }
  0xb5   : > { %v401_v23 = vadd.f32 %v391_v19, %v387_v18  ;;  %v376_v24 = vmul.f32 %v760_v63, %v359_v20 }
  0xb6   : > { %v377_v25 = vmul.f32 %v760_v63, %v366_v21  ;;  %v395_v26 = vrot.slane %v394_v22, 4 }
  0xb7   : > { %v402_v27 = vrot.slane %v401_v23, 4  ;;  %v782_v28 = vsub.f32 %v311_v48, %v376_v24  ;;  %v784_v29 = vsub.f32 %v314_v50, %v376_v24 }
  0xb8   : > { %v786_v30 = vsub.f32 %v334_v49, %v377_v25  ;;  %v788_v31 = vsub.f32 %v337_v51, %v377_v25  ;;  %v396_v32 = vadd.f32 %v395_v26, %v394_v22 }
  0xb9   : > { %v403_v33 = vadd.f32 %v402_v27, %v401_v23  ;;  %v388_v34 = vmul.f32 %v782_v28, %v782_v28  ;;  %v392_v35 = vmul.f32 %v784_v29, %v784_v29 }
  0xba   : > { %v389_v36 = vmul.f32 %v786_v30, %v786_v30  ;;  %v393_v37 = vmul.f32 %v788_v31, %v788_v31  ;;  %v397_v38 = vrot.slane %v396_v32, 2 }
  0xbb   : > { %v404_v39 = vrot.slane %v403_v33, 2  ;;  %v408_v40 = vadd.f32 %v392_v35, %v388_v34 }
  0xbc   : > { %v415_v41 = vadd.f32 %v393_v37, %v389_v36  ;;  %v398_v42 = vadd.f32 %v397_v38, %v396_v32 }
  0xbd   : > { %v405_v43 = vadd.f32 %v404_v39, %v403_v33  ;;  %v409_v44 = vrot.slane %v408_v40, 4 }
  0xbe   : > { %v416_v45 = vrot.slane %v415_v41, 4  ;;  %v399_v46 = vrot.slane %v398_v42, 1 }
  0xbf   : > { %v406_v47 = vrot.slane %v405_v43, 1  ;;  %v410_v48 = vadd.f32 %v409_v44, %v408_v40  ;;  %v484_v40 = vpop.permute.xlu1 %483 }
  0xc0   : > { %v417_v49 = vadd.f32 %v416_v45, %v415_v41  ;;  %v400_v50 = vadd.f32 %v399_v46, %v398_v42 }
  0xc1   : > { %v407_v51 = vadd.f32 %v406_v47, %v405_v43  ;;  %v411_v52 = vrot.slane %v410_v48, 2 }
  0xc2   : > { %v418_v53 = vrot.slane %v417_v49, 2  ;;  %v422_v54 = vmul.f32 %v400_v50, %v760_v63 }
  0xc3   : > { %v423_v55 = vmul.f32 %v407_v51, %v760_v63  ;;  %v412_v56 = vadd.f32 %v411_v52, %v410_v48 }
  0xc4   : > { %v419_v57 = vadd.f32 %v418_v53, %v417_v49  ;;  %v426_v58 = vadd.f32 1e-05, %v422_v54 }
  0xc5   : > { %v427_v59 = vadd.f32 1e-05, %v423_v55  ;;  %v413_v60 = vrot.slane %v412_v56, 1 }
  0xc6   : > { %v420_v61 = vrot.slane %v419_v57, 1  ;;  %660 = vrsqrt.f32 %v426_v58  ;;  %vm436_vm4 = vweird.f32 %v426_v58 }
  0xc7   : > { %662 = vrsqrt.f32 %v427_v59  ;;  %v414_v62 = vadd.f32 %v413_v60, %v412_v56  ;;  %vm446_vm6 = vweird.f32 %v427_v59 }
  0xc8   : > { %v421_v0 = vadd.f32 %v420_v61, %v419_v57 }
  0xc9   : > { %v424_v1 = vmul.f32 %v414_v62, %v760_v63 }
  0xca   : > { %v425_v2 = vmul.f32 %v421_v0, %v760_v63 }
  0xcb   : > { %v428_v3 = vadd.f32 1e-05, %v424_v1 }
  0xcc   : > { %v429_v4 = vadd.f32 1e-05, %v425_v2  ;;  %v661_v5 = vpop.eup %660 }
  0xcd   : > { %v663_v6 = vpop.eup %662  ;;  %v431_v7 = vmul.f32 %v661_v5, %v426_v58  ;;  %664 = vrsqrt.f32 %v428_v3  ;;  %vm437_vm2 = vweird.f32 %v661_v5  ;;  %vm456_vm10 = vweird.f32 %v428_v3 }
  0xce   : > { %v441_v8 = vmul.f32 %v663_v6, %v427_v59  ;;  %666 = vrsqrt.f32 %v429_v4  ;;  %vm447_vm3 = vweird.f32 %v663_v6  ;;  %vm438_vm5 = vmor %vm436_vm4, %vm437_vm2  ;;  %vm466_vm12 = vweird.f32 %v429_v4 }
  0xcf   : > { %v432_v9 = vmul.f32 %v661_v5, %v431_v7  ;;  %vm448_vm7 = vmor %vm446_vm6, %vm447_vm3 }
  0xd0   : > { %v442_v15 = vmul.f32 %v663_v6, %v441_v8 }
  0xd1   : > { %v433_v16 = vmul.f32 0.5, %v432_v9 }
  0xd2   : > { %v443_v18 = vmul.f32 0.5, %v442_v15 }
  0xd3   : > { %v665_v19 = vpop.eup %664  ;;  %v434_v20 = vsub.f32 1.5, %v433_v16 }
  0xd4   : > { %v667_v63 = vpop.eup %666  ;;  %v444_v21 = vsub.f32 1.5, %v443_v18  ;;  %v451_v22 = vmul.f32 %v665_v19, %v428_v3  ;;  %vm457_vm8 = vweird.f32 %v665_v19 }
  0xd5   : > { %v435_v23 = vmul.f32 %v661_v5, %v434_v20  ;;  %v461_v24 = vmul.f32 %v667_v63, %v429_v4  ;;  %vm467_vm9 = vweird.f32 %v667_v63  ;;  %vm458_vm11 = vmor %vm456_vm10, %vm457_vm8 }
  0xd6   : > { %v445_v25 = vmul.f32 %v663_v6, %v444_v21  ;;  %v452_v26 = vmul.f32 %v665_v19, %v451_v22  ;;  %vm468_vm13 = vmor %vm466_vm12, %vm467_vm9 }
  0xd7   : > { %v439_v27 = vsel %vm438_vm5, %v661_v5, %v435_v23  ;;  %v462_v32 = vmul.f32 %v667_v63, %v461_v24 }
  0xd8   : > { %v470_v33 = vmul.f32 %v439_v27, %v764_v10  ;;  %v474_v34 = vmul.f32 %v439_v27, %v766_v11  ;;  %v449_v35 = vsel %vm448_vm7, %v663_v6, %v445_v25  ;;  %v453_v36 = vmul.f32 0.5, %v452_v26 }
  0xd9   : > { %v471_v37 = vmul.f32 %v449_v35, %v768_v12  ;;  %v475_v38 = vmul.f32 %v449_v35, %v770_v13  ;;  %v463_v39 = vmul.f32 0.5, %v462_v32  ;;  %v500_v12 = vpop.permute.xlu2 %499 }
  0xda   : > { %v454_v41 = vsub.f32 1.5, %v453_v36  ;;  %v486_v42 = vmul.f32 %v802_v14, %v470_v33  ;;  %v490_v43 = vmul.f32 %v484_v40, %v474_v34 }
  0xdb   : > { %v464_v44 = vsub.f32 1.5, %v463_v39  ;;  %v487_v10 = vmul.f32 %v802_v14, %v471_v37  ;;  %v491_v11 = vmul.f32 %v484_v40, %v475_v38 }
  0xdc   : > { %v455_v13 = vmul.f32 %v665_v19, %v454_v41  ;;  %v502_v45 = vadd.f32 %v804_v17, %v486_v42  ;;  %v506_v46 = vadd.f32 %v500_v12, %v490_v43 }
  0xdd   : > { %v465_v47 = vmul.f32 %v667_v63, %v464_v44  ;;  %v503_v48 = vadd.f32 %v804_v17, %v487_v10  ;;  %v507_v49 = vadd.f32 %v500_v12, %v491_v11 }
  0xde   : > { %v459_v50 = vsel %vm458_vm11, %v665_v19, %v455_v13  ;;  %510 = vst [vmem:[%s816_s4] sm:$0xff] %v502_v45 }
  0xdf   : > { %v472_v51 = vmul.f32 %v459_v50, %v782_v28  ;;  %v476_v52 = vmul.f32 %v459_v50, %v784_v29  ;;  %v469_v53 = vsel %vm468_vm13, %v667_v63, %v465_v47  ;;  %511 = vst [vmem:[%s816_s4 + $0x8] sm:$0xff] %v503_v48 }
  0xe0   : > { %v473_v54 = vmul.f32 %v469_v53, %v786_v30  ;;  %v477_v55 = vmul.f32 %v469_v53, %v788_v31  ;;  %514 = vst [vmem:[%s816_s4 + $0x20] sm:$0xff] %v506_v46 }
  0xe1   : > { %v488_v56 = vmul.f32 %v802_v14, %v472_v51  ;;  %v492_v57 = vmul.f32 %v484_v40, %v476_v52  ;;  %515 = vst [vmem:[%s816_s4 + $0x28] sm:$0xff] %v507_v49 }
  0xe2   : > { %v489_v58 = vmul.f32 %v802_v14, %v473_v54  ;;  %v493_v28 = vmul.f32 %v484_v40, %v477_v55 }
  0xe3   : > { %v504_v59 = vadd.f32 %v804_v17, %v488_v56  ;;  %v508_v29 = vadd.f32 %v500_v12, %v492_v57 }
  0xe4   : > { %v505_v60 = vadd.f32 %v804_v17, %v489_v58  ;;  %v509_v61 = vadd.f32 %v500_v12, %v493_v28 }
  0xe5   : > { %512 = vst [vmem:[%s816_s4 + $0x10] sm:$0xff] %v504_v59 }
  0xe6   : > { %513 = vst [vmem:[%s816_s4 + $0x18] sm:$0xff] %v505_v60 }
  0xe7   : > { %516 = vst [vmem:[%s816_s4 + $0x30] sm:$0xff] %v508_v29 }
  0xe8   : > { %517 = vst [vmem:[%s816_s4 + $0x38] sm:$0xff] %v509_v61 }
  0xe9 PF: > { %s13_s14 = sadd.s32 1, %s690_s14   ;;  %s850_s12 = smov %s686_s13 }
  0xea   : > { %p10_p5 = scmp.ge.s32.totalorder %s13_s14, 4   ;;  %s851_s13 = smov %s853_s15 }
  0xec   :  { %12 = sbr.rel (!%p10_p5) target bundleno = 2 (0x2), region = 62 }

</bundles_post_ra>
